<compile_context>
chip_gen: v7x
topology: tpu7x:2x2x1
jax: 0.10.0
libtpu: 0.0.40
codegen_flags: <defaults>
</compile_context>

<pallas_src>
import functools

import jax
import jax.numpy as jnp
from jax.experimental import pallas as pl
from jax.experimental.pallas import tpu as pltpu

LEAKY_SLOPE = 0.01  # nn.LeakyReLU() default negative_slope
LANE = 128
SUBLANE = 8


def _round_up(x, m):
    return (x + m - 1) // m * m


def _leaky_relu(h):
    # identical to where(h > 0, h, a*h) for 0 < a < 1; one fewer VALU op/elem
    return jnp.maximum(h, LEAKY_SLOPE * h)


# ------------------------------ fused kernel ------------------------------- #

def _fused_forward_kernel(layer_meta, *refs):
    """Whole-network forward on one (bm, input_dim) activation tile.

    layer_meta : tuple of (projected: bool, out_dim_padded: int) per block.
    refs       : x_ref, (w_ref, b_ref) per block, w_out_ref, b_out_ref, o_ref.
                 Projected blocks store W as [W_fc | W_res] -> (din, 2*dout_p).
    """
    n_layers = len(layer_meta)
    x_ref = refs[0]
    w_out_ref = refs[1 + 2 * n_layers]
    b_out_ref = refs[2 + 2 * n_layers]
    o_ref = refs[-1]

    x = x_ref[...]  # ideally bf16 already (produced upstream); no forced cast
    for li, (projected, dout_p) in enumerate(layer_meta):
        w_ref = refs[1 + 2 * li]
        b_ref = refs[2 + 2 * li]
        # single lane-dense MXU dot (bf16 inputs, f32 accumulation)
        hr = jnp.dot(x.astype(jnp.bfloat16), w_ref[...],
                     preferred_element_type=jnp.float32)
        if projected:
            h = _leaky_relu(hr[:, :dout_p] + b_ref[...])  # 128-aligned lane slice
            r = hr[:, dout_p:]
        else:
            h = _leaky_relu(hr + b_ref[...])
            r = x.astype(jnp.float32)                     # identity residual
            if r.shape[1] != h.shape[1]:
                # only possible at layer 0 when the unpadded input feeds an
                # identity block whose padded width is larger
                r = jnp.pad(r, ((0, 0), (0, h.shape[1] - r.shape[1])))
        x = h + r                                          # f32 epilogue (VPU)

    out = jnp.dot(x.astype(jnp.bfloat16), w_out_ref[...],
                  preferred_element_type=jnp.float32) + b_out_ref[...]
    o_ref[...] = out.astype(o_ref.dtype)


# --------------------------- parameter construction ------------------------ #

def _linear_init(key, in_dim, out_dim, bias=True):
    """PyTorch nn.Linear default init U(-1/sqrt(in), 1/sqrt(in)).
    Returns W as (in_dim, out_dim) (pre-transposed) and b as (1, out_dim)."""
    kw, kb = jax.random.split(key)
    bound = 1.0 / jnp.sqrt(jnp.float32(in_dim))
    w = jax.random.uniform(kw, (out_dim, in_dim), jnp.float32, -bound, bound).T
    b = (jax.random.uniform(kb, (1, out_dim), jnp.float32, -bound, bound)
         if bias else None)
    return w, b


def _pad2(a, rows, cols):
    return jnp.pad(a, ((0, rows - a.shape[0]), (0, cols - a.shape[1])))


class ResidualNetworkPallas:
    """Pallas-TPU implementation of the Roost ResidualNetwork forward pass."""

    def __init__(self, input_dim, output_dim, hidden_layer_dims, key,
                 block_m=1024, param_dtype=jnp.bfloat16, out_dtype=jnp.float32):
        dims = [input_dim] + list(hidden_layer_dims)
        self.input_dim = input_dim
        self.output_dim = output_dim
        self.block_m = block_m
        self.out_dtype = out_dtype

        # --- unpadded f32 params (kept for the pure-JAX references) ---
        self.layers = []  # (w, b, wres_or_None)
        keys = jax.random.split(key, len(dims))
        for i in range(len(dims) - 1):
            k_fc, k_res = jax.random.split(keys[i])
            w, b = _linear_init(k_fc, dims[i], dims[i + 1], bias=True)
            wres = None
            if dims[i] != dims[i + 1]:
                wres, _ = _linear_init(k_res, dims[i], dims[i + 1], bias=False)
            self.layers.append((w, b, wres))
        self.w_out, self.b_out = _linear_init(keys[-1], dims[-1], output_dim, bias=True)

        # --- fused kernel params ---
        #  * layer-0 K stays at input_dim (activation fed unpadded)
        #  * hidden dims padded to 128 lanes only
        #  * final N stays at output_dim (output written unpadded, no slice)
        dpad = [_round_up(d, LANE) for d in dims]
        layer_meta, kernel_params = [], []
        cur_width = dims[0]  # lane width of the activation entering this layer
        for i, (w, b, wres) in enumerate(self.layers):
            dout_p = dpad[i + 1]
            w_p = _pad2(w, cur_width, dout_p)
            b_p = _pad2(b, 1, dout_p).astype(jnp.float32)
            if wres is not None:
                wres_p = _pad2(wres, cur_width, dout_p)
                w_cat = jnp.concatenate([w_p, wres_p], axis=1)  # (cur, 2*dout_p)
                layer_meta.append((True, dout_p))
            else:
                w_cat = w_p
                layer_meta.append((False, dout_p))
            kernel_params += [w_cat.astype(param_dtype), b_p]
            cur_width = dout_p
        kernel_params += [
            _pad2(self.w_out, cur_width, output_dim).astype(param_dtype),
            _pad2(self.b_out, 1, output_dim).astype(jnp.float32),
        ]
        self.layer_meta = tuple(layer_meta)
        self.kernel_params = kernel_params
        self.kernel_in_dim = dims[0]
        self._max_width = max([p.shape[1] for p in kernel_params[::2]]
                              + [self.kernel_in_dim])

    # ----------------------------- tiling helpers -------------------------- #

    def _choose_bm(self, n):
        n8 = _round_up(max(n, 1), SUBLANE)
        bm = min(self.block_m, n8)
        # v7x has 2 TensorCores: if one block would cover a large batch, split
        # it so the "parallel" batch axis yields >=2 grid steps.
        if bm == n8 and n8 >= 512:
            bm = _round_up(pl.cdiv(n8, 2), SUBLANE)
        return bm

    def _vmem_limit_bytes(self, bm, x_itemsize):
        param_bytes = sum(int(p.size) * p.dtype.itemsize for p in self.kernel_params)
        act = 2 * bm * (self.kernel_in_dim * x_itemsize
                        + self.output_dim * jnp.dtype(self.out_dtype).itemsize)
        inter = 4 * bm * self._max_width * 4
        need = 2 * param_bytes + act + inter
        # v5e default scoped limit is only 16 MiB -> raise to >=32 MiB; cap at
        # 48 MiB so v7x (64 MiB physical VMEM) is never over-committed.
        return int(min(max(int(1.5 * need), 32 << 20), 48 << 20))

    def _cost_estimate(self, n, x_itemsize):
        weight_arrays = self.kernel_params[::2]
        flops = 2 * n * sum(w.shape[0] * w.shape[1] for w in weight_arrays)
        param_bytes = sum(int(p.size) * p.dtype.itemsize for p in self.kernel_params)
        bytes_accessed = (n * self.kernel_in_dim * x_itemsize
                          + n * self.output_dim * jnp.dtype(self.out_dtype).itemsize
                          + param_bytes)
        return pl.CostEstimate(flops=flops, transcendentals=0,
                               bytes_accessed=bytes_accessed)

    # -------------------------------- forward ------------------------------ #

    def _forward(self, fea, bm, single_buffer_weights):
        n = fea.shape[0]
        grid = (pl.cdiv(n, bm),)  # ragged last block: OOB reads padded, writes dropped

        def resident(shape):
            if single_buffer_weights:
                # constant index_map -> no pipelining needed; one VMEM copy.
                return pl.BlockSpec(shape, lambda i: (0, 0),
                                    pipeline_mode=pl.Buffered(1))
            return pl.BlockSpec(shape, lambda i: (0, 0))

        in_specs = [pl.BlockSpec((bm, self.kernel_in_dim), lambda i: (i, 0))]
        in_specs += [resident(p.shape) for p in self.kernel_params]
        out_spec = pl.BlockSpec((bm, self.output_dim), lambda i: (i, 0))

        kernel = functools.partial(_fused_forward_kernel, self.layer_meta)
        return pl.pallas_call(
            kernel,
            out_shape=jax.ShapeDtypeStruct((n, self.output_dim), self.out_dtype),
            grid=grid,
            in_specs=in_specs,
            out_specs=out_spec,
            cost_estimate=self._cost_estimate(n, fea.dtype.itemsize),
            compiler_params=pltpu.CompilerParams(
                dimension_semantics=("parallel",),
                vmem_limit_bytes=self._vmem_limit_bytes(bm, fea.dtype.itemsize)),
        )(fea, *self.kernel_params)

    def __call__(self, fea):
        assert fea.ndim == 2 and fea.shape[1] == self.kernel_in_dim
        bm = self._choose_bm(fea.shape[0])
        try:
            return self._forward(fea, bm, single_buffer_weights=True)
        except Exception:
            # pipeline_mode=pl.Buffered(1) unavailable in this jax -> default specs
            return self._forward(fea, bm, single_buffer_weights=False)


# ------------------------------- references -------------------------------- #

def _reference_forward_f32(model, fea):
    """Pure-f32 reference matching the PyTorch module exactly."""
    for w, b, wres in model.layers:
        h = fea @ w + b
        h = jnp.where(h > 0, h, LEAKY_SLOPE * h)
        r = fea if wres is None else fea @ wres
        fea = h + r
    return fea @ model.w_out + model.b_out


def _reference_forward_bf16(model, fea):
    """Reference that emulates the kernel's bf16-input / f32-accumulate dots."""
    def bdot(a, b):
        return jnp.dot(a.astype(jnp.bfloat16), b.astype(jnp.bfloat16),
                       preferred_element_type=jnp.float32)
    for w, b, wres in model.layers:
        h = bdot(fea, w) + b
        h = jnp.where(h > 0, h, LEAKY_SLOPE * h)
        r = fea if wres is None else bdot(fea, wres)
        fea = h + r
    return bdot(fea, model.w_out) + model.b_out


if __name__ == "__main__":
    key = jax.random.PRNGKey(0)
    k_param, k_x = jax.random.split(key)

    batch = 8
    input_dim = 32
    hidden_layer_dims = [64, 64, 32]   # exercises projected and identity residuals
    output_dim = 16

    model = ResidualNetworkPallas(input_dim, output_dim, hidden_layer_dims, k_param)

    # The kernel is fed bf16 activations (in a real Roost graph this cast is
    # fused into the upstream producer, not a standalone wrapper astype).
    x_bf16 = jax.random.normal(k_x, (batch, input_dim), jnp.float32).astype(jnp.bfloat16)
    x_f32 = x_bf16.astype(jnp.float32)

    out = jax.block_until_ready(model(x_bf16))
    assert out.shape == (batch, output_dim)

    # tight check vs a reference using the same bf16-input dots
    ref_bf16 = _reference_forward_bf16(model, x_f32)
    assert jnp.allclose(out, ref_bf16, atol=2e-3, rtol=2e-3), "mismatch vs bf16 reference"

    # sanity check vs the exact PyTorch (f32) semantics, loosened for bf16 weights
    ref_f32 = _reference_forward_f32(model, x_f32)
    assert jnp.allclose(out, ref_f32, atol=1e-1, rtol=1e-1), "mismatch vs f32 reference"

    print("KERNEL_OK")
</pallas_src>

<mosaic_0001>
module attributes {stable_mosaic.version = 11 : i64} {
  func.func @_fused_forward_kernel(%arg0: i32, %arg1: memref<8x32xbf16, #tpu.memory_space<vmem>>, %arg2: memref<32x256xbf16, #tpu.memory_space<vmem>>, %arg3: memref<1x128xf32, #tpu.memory_space<vmem>>, %arg4: memref<128x128xbf16, #tpu.memory_space<vmem>>, %arg5: memref<1x128xf32, #tpu.memory_space<vmem>>, %arg6: memref<128x256xbf16, #tpu.memory_space<vmem>>, %arg7: memref<1x128xf32, #tpu.memory_space<vmem>>, %arg8: memref<128x16xbf16, #tpu.memory_space<vmem>>, %arg9: memref<1x16xf32, #tpu.memory_space<vmem>>, %arg10: memref<8x16xf32, #tpu.memory_space<vmem>>) attributes {dimension_semantics = [#tpu.dimension_semantics<parallel>], iteration_bounds = array<i64: 1>, scalar_prefetch = 0 : i64, scratch_operands = 0 : i64, tpu.core_type = #tpu.core_type<tc>, window_params = [{transform_indices = @transform_0, window_bounds = array<i64: 8, 32>}, {pipeline_mode = #tpu.pipeline_mode<synchronous>, transform_indices = @transform_1, window_bounds = array<i64: 32, 256>}, {pipeline_mode = #tpu.pipeline_mode<synchronous>, transform_indices = @transform_2, window_bounds = array<i64: 1, 128>}, {pipeline_mode = #tpu.pipeline_mode<synchronous>, transform_indices = @transform_3, window_bounds = array<i64: 128, 128>}, {pipeline_mode = #tpu.pipeline_mode<synchronous>, transform_indices = @transform_4, window_bounds = array<i64: 1, 128>}, {pipeline_mode = #tpu.pipeline_mode<synchronous>, transform_indices = @transform_5, window_bounds = array<i64: 128, 256>}, {pipeline_mode = #tpu.pipeline_mode<synchronous>, transform_indices = @transform_6, window_bounds = array<i64: 1, 128>}, {pipeline_mode = #tpu.pipeline_mode<synchronous>, transform_indices = @transform_7, window_bounds = array<i64: 128, 16>}, {pipeline_mode = #tpu.pipeline_mode<synchronous>, transform_indices = @transform_8, window_bounds = array<i64: 1, 16>}, {transform_indices = @transform_9, window_bounds = array<i64: 8, 16>}]} {
    %c0 = arith.constant 0 : index
    %c0_0 = arith.constant 0 : index
    %0 = vector.load %arg1[%c0, %c0_0] : memref<8x32xbf16, #tpu.memory_space<vmem>>, vector<8x32xbf16>
    %c0_1 = arith.constant 0 : index
    %c0_2 = arith.constant 0 : index
    %1 = vector.load %arg2[%c0_1, %c0_2] : memref<32x256xbf16, #tpu.memory_space<vmem>>, vector<32x256xbf16>
    %cst = arith.constant dense<0.000000e+00> : vector<8x256xf32>
    %2 = tpu.matmul %0, %1, %cst {dimension_numbers = #tpu.dot_dimension_numbers<[1], [0], [0], [1], [0, 0, 1, 1], [], []>} : vector<8x32xbf16>, vector<32x256xbf16>, vector<8x256xf32> -> vector<8x256xf32>
    %3 = vector.extract_strided_slice %2 {offsets = [0, 0], sizes = [8, 128], strides = [1, 1]} : vector<8x256xf32> to vector<8x128xf32>
    %c0_3 = arith.constant 0 : index
    %c0_4 = arith.constant 0 : index
    %4 = vector.load %arg3[%c0_3, %c0_4] : memref<1x128xf32, #tpu.memory_space<vmem>>, vector<1x128xf32>
    %5 = vector.broadcast %4 : vector<1x128xf32> to vector<8x128xf32>
    %6 = arith.addf %3, %5 : vector<8x128xf32>
    %cst_5 = arith.constant 0.00999999977 : f32
    %7 = vector.broadcast %cst_5 : f32 to vector<8x128xf32>
    %8 = arith.mulf %7, %6 : vector<8x128xf32>
    %9 = arith.maximumf %6, %8 : vector<8x128xf32>
    %10 = vector.extract_strided_slice %2 {offsets = [0, 128], sizes = [8, 128], strides = [1, 1]} : vector<8x256xf32> to vector<8x128xf32>
    %11 = arith.addf %9, %10 : vector<8x128xf32>
    %12 = arith.truncf %11 : vector<8x128xf32> to vector<8x128xbf16>
    %c0_6 = arith.constant 0 : index
    %c0_7 = arith.constant 0 : index
    %13 = vector.load %arg4[%c0_6, %c0_7] : memref<128x128xbf16, #tpu.memory_space<vmem>>, vector<128x128xbf16>
    %cst_8 = arith.constant dense<0.000000e+00> : vector<8x128xf32>
    %14 = tpu.matmul %12, %13, %cst_8 {dimension_numbers = #tpu.dot_dimension_numbers<[1], [0], [0], [1], [0, 0, 1, 1], [], []>} : vector<8x128xbf16>, vector<128x128xbf16>, vector<8x128xf32> -> vector<8x128xf32>
    %c0_9 = arith.constant 0 : index
    %c0_10 = arith.constant 0 : index
    %15 = vector.load %arg5[%c0_9, %c0_10] : memref<1x128xf32, #tpu.memory_space<vmem>>, vector<1x128xf32>
    %16 = vector.broadcast %15 : vector<1x128xf32> to vector<8x128xf32>
    %17 = arith.addf %14, %16 : vector<8x128xf32>
    %cst_11 = arith.constant 0.00999999977 : f32
    %18 = vector.broadcast %cst_11 : f32 to vector<8x128xf32>
    %19 = arith.mulf %18, %17 : vector<8x128xf32>
    %20 = arith.maximumf %17, %19 : vector<8x128xf32>
    %21 = arith.addf %20, %11 : vector<8x128xf32>
    %22 = arith.truncf %21 : vector<8x128xf32> to vector<8x128xbf16>
    %c0_12 = arith.constant 0 : index
    %c0_13 = arith.constant 0 : index
    %23 = vector.load %arg6[%c0_12, %c0_13] : memref<128x256xbf16, #tpu.memory_space<vmem>>, vector<128x256xbf16>
    %cst_14 = arith.constant dense<0.000000e+00> : vector<8x256xf32>
    %24 = tpu.matmul %22, %23, %cst_14 {dimension_numbers = #tpu.dot_dimension_numbers<[1], [0], [0], [1], [0, 0, 1, 1], [], []>} : vector<8x128xbf16>, vector<128x256xbf16>, vector<8x256xf32> -> vector<8x256xf32>
    %25 = vector.extract_strided_slice %24 {offsets = [0, 0], sizes = [8, 128], strides = [1, 1]} : vector<8x256xf32> to vector<8x128xf32>
    %c0_15 = arith.constant 0 : index
    %c0_16 = arith.constant 0 : index
    %26 = vector.load %arg7[%c0_15, %c0_16] : memref<1x128xf32, #tpu.memory_space<vmem>>, vector<1x128xf32>
    %27 = vector.broadcast %26 : vector<1x128xf32> to vector<8x128xf32>
    %28 = arith.addf %25, %27 : vector<8x128xf32>
    %cst_17 = arith.constant 0.00999999977 : f32
    %29 = vector.broadcast %cst_17 : f32 to vector<8x128xf32>
    %30 = arith.mulf %29, %28 : vector<8x128xf32>
    %31 = arith.maximumf %28, %30 : vector<8x128xf32>
    %32 = vector.extract_strided_slice %24 {offsets = [0, 128], sizes = [8, 128], strides = [1, 1]} : vector<8x256xf32> to vector<8x128xf32>
    %33 = arith.addf %31, %32 : vector<8x128xf32>
    %34 = arith.truncf %33 : vector<8x128xf32> to vector<8x128xbf16>
    %c0_18 = arith.constant 0 : index
    %c0_19 = arith.constant 0 : index
    %35 = vector.load %arg8[%c0_18, %c0_19] : memref<128x16xbf16, #tpu.memory_space<vmem>>, vector<128x16xbf16>
    %cst_20 = arith.constant dense<0.000000e+00> : vector<8x16xf32>
    %36 = tpu.matmul %34, %35, %cst_20 {dimension_numbers = #tpu.dot_dimension_numbers<[1], [0], [0], [1], [0, 0, 1, 1], [], []>} : vector<8x128xbf16>, vector<128x16xbf16>, vector<8x16xf32> -> vector<8x16xf32>
    %c0_21 = arith.constant 0 : index
    %c0_22 = arith.constant 0 : index
    %37 = vector.load %arg9[%c0_21, %c0_22] : memref<1x16xf32, #tpu.memory_space<vmem>>, vector<1x16xf32>
    %38 = vector.broadcast %37 : vector<1x16xf32> to vector<8x16xf32>
    %39 = arith.addf %36, %38 : vector<8x16xf32>
    %c0_23 = arith.constant 0 : index
    %c0_24 = arith.constant 0 : index
    %40 = vector.load %arg10[%c0_23, %c0_24] : memref<8x16xf32, #tpu.memory_space<vmem>>, vector<8x16xf32>
    tpu.vector_store %arg10[%c0_23, %c0_24], %39 {strides = array<i32>} : memref<8x16xf32, #tpu.memory_space<vmem>>, vector<8x16xf32>,
    return
  }
  func.func @transform_0(%arg0: i32) -> (i32, i32) {
    %c0_i32 = arith.constant 0 : i32
    %c0_i32_0 = arith.constant 0 : i32
    return %arg0, %c0_i32 : i32, i32
  }
  func.func @transform_1(%arg0: i32) -> (i32, i32) {
    %c0_i32 = arith.constant 0 : i32
    %c0_i32_0 = arith.constant 0 : i32
    %c0_i32_1 = arith.constant 0 : i32
    return %c0_i32, %c0_i32_0 : i32, i32
  }
  func.func @transform_2(%arg0: i32) -> (i32, i32) {
    %c0_i32 = arith.constant 0 : i32
    %c0_i32_0 = arith.constant 0 : i32
    %c0_i32_1 = arith.constant 0 : i32
    return %c0_i32, %c0_i32_0 : i32, i32
  }
  func.func @transform_3(%arg0: i32) -> (i32, i32) {
    %c0_i32 = arith.constant 0 : i32
    %c0_i32_0 = arith.constant 0 : i32
    %c0_i32_1 = arith.constant 0 : i32
    return %c0_i32, %c0_i32_0 : i32, i32
  }
  func.func @transform_4(%arg0: i32) -> (i32, i32) {
    %c0_i32 = arith.constant 0 : i32
    %c0_i32_0 = arith.constant 0 : i32
    %c0_i32_1 = arith.constant 0 : i32
    return %c0_i32, %c0_i32_0 : i32, i32
  }
  func.func @transform_5(%arg0: i32) -> (i32, i32) {
    %c0_i32 = arith.constant 0 : i32
    %c0_i32_0 = arith.constant 0 : i32
    %c0_i32_1 = arith.constant 0 : i32
    return %c0_i32, %c0_i32_0 : i32, i32
  }
  func.func @transform_6(%arg0: i32) -> (i32, i32) {
    %c0_i32 = arith.constant 0 : i32
    %c0_i32_0 = arith.constant 0 : i32
    %c0_i32_1 = arith.constant 0 : i32
    return %c0_i32, %c0_i32_0 : i32, i32
  }
  func.func @transform_7(%arg0: i32) -> (i32, i32) {
    %c0_i32 = arith.constant 0 : i32
    %c0_i32_0 = arith.constant 0 : i32
    %c0_i32_1 = arith.constant 0 : i32
    return %c0_i32, %c0_i32_0 : i32, i32
  }
  func.func @transform_8(%arg0: i32) -> (i32, i32) {
    %c0_i32 = arith.constant 0 : i32
    %c0_i32_0 = arith.constant 0 : i32
    %c0_i32_1 = arith.constant 0 : i32
    return %c0_i32, %c0_i32_0 : i32, i32
  }
  func.func @transform_9(%arg0: i32) -> (i32, i32) {
    %c0_i32 = arith.constant 0 : i32
    %c0_i32_0 = arith.constant 0 : i32
    return %arg0, %c0_i32 : i32, i32
  }
}

module attributes {stable_mosaic.version = 11 : i64} {
  func.func @_fused_forward_kernel(%arg0: i32, %arg1: memref<8x32xbf16, #tpu.memory_space<vmem>>, %arg2: memref<32x256xbf16, #tpu.memory_space<vmem>>, %arg3: memref<1x128xf32, #tpu.memory_space<vmem>>, %arg4: memref<128x128xbf16, #tpu.memory_space<vmem>>, %arg5: memref<1x128xf32, #tpu.memory_space<vmem>>, %arg6: memref<128x256xbf16, #tpu.memory_space<vmem>>, %arg7: memref<1x128xf32, #tpu.memory_space<vmem>>, %arg8: memref<128x16xbf16, #tpu.memory_space<vmem>>, %arg9: memref<1x16xf32, #tpu.memory_space<vmem>>, %arg10: memref<8x16xf32, #tpu.memory_space<vmem>>) attributes {dimension_semantics = [#tpu.dimension_semantics<parallel>], iteration_bounds = array<i64: 1>, scalar_prefetch = 0 : i64, scratch_operands = 0 : i64, tpu.core_type = #tpu.core_type<tc>, window_params = [{transform_indices = @transform_0, window_bounds = array<i64: 8, 32>}, {pipeline_mode = #tpu.pipeline_mode<synchronous>, transform_indices = @transform_1, window_bounds = array<i64: 32, 256>}, {pipeline_mode = #tpu.pipeline_mode<synchronous>, transform_indices = @transform_2, window_bounds = array<i64: 1, 128>}, {pipeline_mode = #tpu.pipeline_mode<synchronous>, transform_indices = @transform_3, window_bounds = array<i64: 128, 128>}, {pipeline_mode = #tpu.pipeline_mode<synchronous>, transform_indices = @transform_4, window_bounds = array<i64: 1, 128>}, {pipeline_mode = #tpu.pipeline_mode<synchronous>, transform_indices = @transform_5, window_bounds = array<i64: 128, 256>}, {pipeline_mode = #tpu.pipeline_mode<synchronous>, transform_indices = @transform_6, window_bounds = array<i64: 1, 128>}, {pipeline_mode = #tpu.pipeline_mode<synchronous>, transform_indices = @transform_7, window_bounds = array<i64: 128, 16>}, {pipeline_mode = #tpu.pipeline_mode<synchronous>, transform_indices = @transform_8, window_bounds = array<i64: 1, 16>}, {transform_indices = @transform_9, window_bounds = array<i64: 8, 16>}]} {
    %c0 = arith.constant 0 : index
    %c0_0 = arith.constant 0 : index
    %0 = vector.load %arg1[%c0, %c0_0] : memref<8x32xbf16, #tpu.memory_space<vmem>>, vector<8x32xbf16>
    %c0_1 = arith.constant 0 : index
    %c0_2 = arith.constant 0 : index
    %1 = vector.load %arg2[%c0_1, %c0_2] : memref<32x256xbf16, #tpu.memory_space<vmem>>, vector<32x256xbf16>
    %cst = arith.constant dense<0.000000e+00> : vector<8x256xf32>
    %2 = tpu.matmul %0, %1, %cst {dimension_numbers = #tpu.dot_dimension_numbers<[1], [0], [0], [1], [0, 0, 1, 1], [], []>} : vector<8x32xbf16>, vector<32x256xbf16>, vector<8x256xf32> -> vector<8x256xf32>
    %3 = vector.extract_strided_slice %2 {offsets = [0, 0], sizes = [8, 128], strides = [1, 1]} : vector<8x256xf32> to vector<8x128xf32>
    %c0_3 = arith.constant 0 : index
    %c0_4 = arith.constant 0 : index
    %4 = vector.load %arg3[%c0_3, %c0_4] : memref<1x128xf32, #tpu.memory_space<vmem>>, vector<1x128xf32>
    %5 = vector.broadcast %4 : vector<1x128xf32> to vector<8x128xf32>
    %6 = arith.addf %3, %5 : vector<8x128xf32>
    %cst_5 = arith.constant 0.00999999977 : f32
    %7 = vector.broadcast %cst_5 : f32 to vector<8x128xf32>
    %8 = arith.mulf %7, %6 : vector<8x128xf32>
    %9 = arith.maximumf %6, %8 : vector<8x128xf32>
    %10 = vector.extract_strided_slice %2 {offsets = [0, 128], sizes = [8, 128], strides = [1, 1]} : vector<8x256xf32> to vector<8x128xf32>
    %11 = arith.addf %9, %10 : vector<8x128xf32>
    %12 = arith.truncf %11 : vector<8x128xf32> to vector<8x128xbf16>
    %c0_6 = arith.constant 0 : index
    %c0_7 = arith.constant 0 : index
    %13 = vector.load %arg4[%c0_6, %c0_7] : memref<128x128xbf16, #tpu.memory_space<vmem>>, vector<128x128xbf16>
    %cst_8 = arith.constant dense<0.000000e+00> : vector<8x128xf32>
    %14 = tpu.matmul %12, %13, %cst_8 {dimension_numbers = #tpu.dot_dimension_numbers<[1], [0], [0], [1], [0, 0, 1, 1], [], []>} : vector<8x128xbf16>, vector<128x128xbf16>, vector<8x128xf32> -> vector<8x128xf32>
    %c0_9 = arith.constant 0 : index
    %c0_10 = arith.constant 0 : index
    %15 = vector.load %arg5[%c0_9, %c0_10] : memref<1x128xf32, #tpu.memory_space<vmem>>, vector<1x128xf32>
    %16 = vector.broadcast %15 : vector<1x128xf32> to vector<8x128xf32>
    %17 = arith.addf %14, %16 : vector<8x128xf32>
    %cst_11 = arith.constant 0.00999999977 : f32
    %18 = vector.broadcast %cst_11 : f32 to vector<8x128xf32>
    %19 = arith.mulf %18, %17 : vector<8x128xf32>
    %20 = arith.maximumf %17, %19 : vector<8x128xf32>
    %21 = arith.addf %20, %11 : vector<8x128xf32>
    %22 = arith.truncf %21 : vector<8x128xf32> to vector<8x128xbf16>
    %c0_12 = arith.constant 0 : index
    %c0_13 = arith.constant 0 : index
    %23 = vector.load %arg6[%c0_12, %c0_13] : memref<128x256xbf16, #tpu.memory_space<vmem>>, vector<128x256xbf16>
    %cst_14 = arith.constant dense<0.000000e+00> : vector<8x256xf32>
    %24 = tpu.matmul %22, %23, %cst_14 {dimension_numbers = #tpu.dot_dimension_numbers<[1], [0], [0], [1], [0, 0, 1, 1], [], []>} : vector<8x128xbf16>, vector<128x256xbf16>, vector<8x256xf32> -> vector<8x256xf32>
    %25 = vector.extract_strided_slice %24 {offsets = [0, 0], sizes = [8, 128], strides = [1, 1]} : vector<8x256xf32> to vector<8x128xf32>
    %c0_15 = arith.constant 0 : index
    %c0_16 = arith.constant 0 : index
    %26 = vector.load %arg7[%c0_15, %c0_16] : memref<1x128xf32, #tpu.memory_space<vmem>>, vector<1x128xf32>
    %27 = vector.broadcast %26 : vector<1x128xf32> to vector<8x128xf32>
    %28 = arith.addf %25, %27 : vector<8x128xf32>
    %cst_17 = arith.constant 0.00999999977 : f32
    %29 = vector.broadcast %cst_17 : f32 to vector<8x128xf32>
    %30 = arith.mulf %29, %28 : vector<8x128xf32>
    %31 = arith.maximumf %28, %30 : vector<8x128xf32>
    %32 = vector.extract_strided_slice %24 {offsets = [0, 128], sizes = [8, 128], strides = [1, 1]} : vector<8x256xf32> to vector<8x128xf32>
    %33 = arith.addf %31, %32 : vector<8x128xf32>
    %34 = arith.truncf %33 : vector<8x128xf32> to vector<8x128xbf16>
    %c0_18 = arith.constant 0 : index
    %c0_19 = arith.constant 0 : index
    %35 = vector.load %arg8[%c0_18, %c0_19] : memref<128x16xbf16, #tpu.memory_space<vmem>>, vector<128x16xbf16>
    %cst_20 = arith.constant dense<0.000000e+00> : vector<8x16xf32>
    %36 = tpu.matmul %34, %35, %cst_20 {dimension_numbers = #tpu.dot_dimension_numbers<[1], [0], [0], [1], [0, 0, 1, 1], [], []>} : vector<8x128xbf16>, vector<128x16xbf16>, vector<8x16xf32> -> vector<8x16xf32>
    %c0_21 = arith.constant 0 : index
    %c0_22 = arith.constant 0 : index
    %37 = vector.load %arg9[%c0_21, %c0_22] : memref<1x16xf32, #tpu.memory_space<vmem>>, vector<1x16xf32>
    %38 = vector.broadcast %37 : vector<1x16xf32> to vector<8x16xf32>
    %39 = arith.addf %36, %38 : vector<8x16xf32>
    %c0_23 = arith.constant 0 : index
    %c0_24 = arith.constant 0 : index
    %40 = vector.load %arg10[%c0_23, %c0_24] : memref<8x16xf32, #tpu.memory_space<vmem>>, vector<8x16xf32>
    tpu.vector_store %arg10[%c0_23, %c0_24], %39 {strides = array<i32>} : memref<8x16xf32, #tpu.memory_space<vmem>>, vector<8x16xf32>,
    return
  }
  func.func @transform_0(%arg0: i32) -> (i32, i32) {
    %c0_i32 = arith.constant 0 : i32
    %c0_i32_0 = arith.constant 0 : i32
    return %arg0, %c0_i32 : i32, i32
  }
  func.func @transform_1(%arg0: i32) -> (i32, i32) {
    %c0_i32 = arith.constant 0 : i32
    %c0_i32_0 = arith.constant 0 : i32
    %c0_i32_1 = arith.constant 0 : i32
    return %c0_i32, %c0_i32_0 : i32, i32
  }
  func.func @transform_2(%arg0: i32) -> (i32, i32) {
    %c0_i32 = arith.constant 0 : i32
    %c0_i32_0 = arith.constant 0 : i32
    %c0_i32_1 = arith.constant 0 : i32
    return %c0_i32, %c0_i32_0 : i32, i32
  }
  func.func @transform_3(%arg0: i32) -> (i32, i32) {
    %c0_i32 = arith.constant 0 : i32
    %c0_i32_0 = arith.constant 0 : i32
    %c0_i32_1 = arith.constant 0 : i32
    return %c0_i32, %c0_i32_0 : i32, i32
  }
  func.func @transform_4(%arg0: i32) -> (i32, i32) {
    %c0_i32 = arith.constant 0 : i32
    %c0_i32_0 = arith.constant 0 : i32
    %c0_i32_1 = arith.constant 0 : i32
    return %c0_i32, %c0_i32_0 : i32, i32
  }
  func.func @transform_5(%arg0: i32) -> (i32, i32) {
    %c0_i32 = arith.constant 0 : i32
    %c0_i32_0 = arith.constant 0 : i32
    %c0_i32_1 = arith.constant 0 : i32
    return %c0_i32, %c0_i32_0 : i32, i32
  }
  func.func @transform_6(%arg0: i32) -> (i32, i32) {
    %c0_i32 = arith.constant 0 : i32
    %c0_i32_0 = arith.constant 0 : i32
    %c0_i32_1 = arith.constant 0 : i32
    return %c0_i32, %c0_i32_0 : i32, i32
  }
  func.func @transform_7(%arg0: i32) -> (i32, i32) {
    %c0_i32 = arith.constant 0 : i32
    %c0_i32_0 = arith.constant 0 : i32
    %c0_i32_1 = arith.constant 0 : i32
    return %c0_i32, %c0_i32_0 : i32, i32
  }
  func.func @transform_8(%arg0: i32) -> (i32, i32) {
    %c0_i32 = arith.constant 0 : i32
    %c0_i32_0 = arith.constant 0 : i32
    %c0_i32_1 = arith.constant 0 : i32
    return %c0_i32, %c0_i32_0 : i32, i32
  }
  func.func @transform_9(%arg0: i32) -> (i32, i32) {
    %c0_i32 = arith.constant 0 : i32
    %c0_i32_0 = arith.constant 0 : i32
    return %arg0, %c0_i32 : i32, i32
  }
}

</mosaic_0001>

<bundles_post_ra>
// kernel: tpu_custom_call.1
= control target key start
LH: loop header
LB: loop body
LE: loop exit
PB: predicated region body
PF: predicated region fallthrough
CT: control target
= control target key end

     0   :  { %14 = vsyncpa [#allocation3], 0  ;;  %s939_s0 = inlined_call_operand.vmem [shape: bf16[8,32], index: 0, kind: input, shape index: {}]   ;;  %s940_s1 = inlined_call_operand.hbm [shape: bf16[32,256], index: 1, kind: input, shape index: {}]   ;;  %s941_s2 = inlined_call_operand.vmem [shape: f32[1,128], index: 2, kind: input, shape index: {}]   ;;  %s942_s3 = inlined_call_operand.vmem [shape: bf16[128,128], index: 3, kind: input, shape index: {}]   ;;  %s943_s4 = inlined_call_operand.vmem [shape: f32[1,128], index: 4, kind: input, shape index: {}]   ;;  %s944_s5 = inlined_call_operand.hbm [shape: bf16[128,256], index: 5, kind: input, shape index: {}]   ;;  %s945_s6 = inlined_call_operand.vmem [shape: f32[1,128], index: 6, kind: input, shape index: {}]   ;;  %s946_s7 = inlined_call_operand.vmem [shape: bf16[128,16], index: 7, kind: input, shape index: {}]   ;;  %s947_s8 = inlined_call_operand.vmem [shape: f32[1,16], index: 8, kind: input, shape index: {}]   ;;  %s948_s9 = inlined_call_operand.hbm [shape: f32[8,16], index: 9, kind: output, shape index: {}]  }
   0x1   :  { %15 = vsyncpa [#allocation6], 0 }
   0x2   :  { %16 = vsyncpa [#allocation4], 0  ;;  %s762_s30 = smov [#allocation2]   ;;  %s690_s13 = scalar_lea.hbm %s940_s1, 512 }
   0x3   :  { %s24_s10 = sshll.u32 %s762_s30, 4  ;;  %p691_p0 = scmp.ne.s32.totalorder %s940_s1, %s690_s13  ;;  %s25_s10 = int_to_ptr.vmem [resolvable:$true] %s24_s10 }
   0x4   :  { %p694_p1 = scmp.lt.u32.totalorder %s690_s13, %s940_s1 }
   0x6   :  { %p696_p2 = pnand %p694_p1, %p691_p0 }
   0x8   :  { %699 = shalt.err (!%p696_p2)
}
   0x9   :  { %s700_s18 = scalar_lea.vmem %s25_s10, 512  ;;  %p705_p4 = scmp.lt.s32.totalorder %s25_s10, %s25_s10 }
   0xa   :  { %p701_p3 = scmp.ne.s32.totalorder %s25_s10, %s700_s18  ;;  %p706_p5 = scmp.lt.s32.totalorder %s700_s18, %s700_s18 }
   0xc   :  { %p707_p6 = por %p706_p5, %p705_p4 }
   0xe   :  { %p708_p7 = pnand %p707_p6, %p701_p3 }
  0x10   :  { %711 = shalt.err (!%p708_p7)
}
  0x11   :  { %s763_s19 = smov 128   ;;  %s764_s20 = smov 8  }
  0x12   :  { %30 = dma.hbm_to_vmem [thread:$0]  %s940_s1, 512, %s25_s10, [#allocation3], %s763_s19, %s763_s19, %s764_s20  }
  0x13   :  { %s765_s23 = smov [#allocation5]   ;;  %s712_s27 = scalar_lea.hbm %s944_s5, 2048 }
  0x14   :  { %s42_s24 = sshll.u32 %s765_s23, 4  ;;  %p713_p8 = scmp.ne.s32.totalorder %s944_s5, %s712_s27  ;;  %s43_s24 = int_to_ptr.vmem [resolvable:$true] %s42_s24 }
  0x15   :  { %p716_p9 = scmp.lt.u32.totalorder %s712_s27, %s944_s5 }
  0x17   :  { %p718_p10 = pnand %p716_p9, %p713_p8 }
  0x19   :  { %721 = shalt.err (!%p718_p10)
}
  0x1a   :  { %s722_s12 = scalar_lea.vmem %s43_s24, 2048  ;;  %p727_p12 = scmp.lt.s32.totalorder %s43_s24, %s43_s24 }
  0x1b   :  { %p723_p11 = scmp.ne.s32.totalorder %s43_s24, %s722_s12  ;;  %p728_p13 = scmp.lt.s32.totalorder %s722_s12, %s722_s12 }
  0x1d   :  { %p729_p0 = por %p728_p13, %p727_p12 }
  0x1f   :  { %p730_p1 = pnand %p729_p0, %p723_p11 }
  0x21   :  { %733 = shalt.err (!%p730_p1)
}
  0x22   :  { %48 = dma.hbm_to_vmem [thread:$0]  %s944_s5, 2048, %s43_s24, [#allocation6], %s763_s19, %s763_s19, %s764_s20  }
  0x23   :  { %756 = dma.done.wait [#allocation3], 512  }
  0x24   :  { %757 = vsyncadd [#allocation3], 4294966784 }
  0x25   :  { %758 = dma.done.wait [#allocation6], 2048  }
  0x26   :  { %759 = vsyncadd [#allocation6], 4294965248  ;;  %v766_v0 = vmov 0   ;;  %v767_v1 = vmov 0.0   ;;  %v644_v2 = vld [vmem:[#allocation2 + $0x4] ss:$8 sps:$4 sm:$0xff]  }
  0x27   :  { %123 = vmatprep.mubr.bf16.mxu0 %v766_v0  ;;  %596 = vmatprep.subr.bf16.mxu1 %v767_v1  ;;  %v646_v3 = vld [vmem:[#allocation2] ss:$8 sps:$4 sm:$0xff]   ;;  %v647_v4 = vld [vmem:[#allocation2 + $0x14] ss:$8 sps:$4 sm:$0xff]   ;;  %v649_v5 = vld [vmem:[#allocation2 + $0x10] ss:$8 sps:$4 sm:$0xff]  }
  0x28   :  { %91 = vmatprep.subr.bf16.mxu0 %v644_v2  ;;  %v650_v6 = vld [vmem:[%s942_s3] sm:$0xff]   ;;  %v651_v7 = vld [vmem:[%s942_s3 + $0x8] sm:$0xff]   ;;  %vm87_vm0 = vcmask 261120   ;;  %v652_v9 = vld [vmem:[%s942_s3 + $0x10] sm:$0xff]   ;;  %vm768_vm1 = vmmov 0   ;;  %vm519_vm2 = vcmask 130048  }
  0x29   :  { %92 = vmatpush1.bf16.msra.mxu0 %v646_v3  ;;  %597 = vmatpush3.bf16.msra.mxu1 %v650_v6  ;;  %v62_v8 = vld [vmem:[%s939_s0] sm:$0xf]  ;;  %v653_v10 = vld [vmem:[%s942_s3 + $0x18] sm:$0xff]   ;;  %v655_v12 = vld [vmem:[%s942_s3 + $0x28] sm:$0xff]  }
  0x2a   :  { %93 = vmatprep.subr.bf16.mxu0 %v647_v4  ;;  %598 = vmatprep.subr.bf16.mxu1 %v767_v1  ;;  %v654_v11 = vld [vmem:[%s942_s3 + $0x20] sm:$0xff]   ;;  %v656_v13 = vld [vmem:[%s942_s3 + $0x30] sm:$0xff]   ;;  %v657_v14 = vld [vmem:[%s942_s3 + $0x38] sm:$0xff]  }
  0x2b   :  { %612 = vmatprep.mubr.msk.bf16.mxu1 %vm768_vm1, %v767_v1  ;;  %v658_v15 = vld [vmem:[#allocation5] ss:$8 sps:$4 sm:$0xff]   ;;  %v660_v16 = vld [vmem:[#allocation5 + $0x4] ss:$8 sps:$4 sm:$0xff]   ;;  %v663_v17 = vld [vmem:[#allocation5 + $0x14] ss:$8 sps:$4 sm:$0xff]  }
  0x2c   :  { %v661_v18 = vld [vmem:[#allocation5 + $0x10] ss:$8 sps:$4 sm:$0xff]   ;;  %v666_v19 = vld [vmem:[#allocation5 + $0x24] ss:$8 sps:$4 sm:$0xff]   ;;  %v664_v20 = vld [vmem:[#allocation5 + $0x20] ss:$8 sps:$4 sm:$0xff]  }
  0x2d   :  { %94 = vmatpush1.bf16.msra.mxu0 %v649_v5  ;;  %599 = vmatpush3.bf16.msra.mxu1 %v651_v7  ;;  %v669_v21 = vld [vmem:[#allocation5 + $0x34] ss:$8 sps:$4 sm:$0xff]   ;;  %v667_v22 = vld [vmem:[#allocation5 + $0x30] ss:$8 sps:$4 sm:$0xff]   ;;  %v672_v23 = vld [vmem:[#allocation5 + $0x44] ss:$8 sps:$4 sm:$0xff]  }
  0x2e   :  { %600 = vmatprep.subr.bf16.mxu1 %v767_v1  ;;  %355 = vmatprep.subr.bf16.mxu0 %v660_v16  ;;  %v670_v24 = vld [vmem:[#allocation5 + $0x40] ss:$8 sps:$4 sm:$0xff]   ;;  %v675_v25 = vld [vmem:[#allocation5 + $0x54] ss:$8 sps:$4 sm:$0xff]   ;;  %v673_v26 = vld [vmem:[#allocation5 + $0x50] ss:$8 sps:$4 sm:$0xff]  }
  0x2f   :  { %v542_v27 = vld [vmem:[%s941_s2] ss:$0 sm:$0xff]  ;;  %v678_v37 = vld [vmem:[#allocation5 + $0x64] ss:$8 sps:$4 sm:$0xff]   ;;  %v681_v39 = vld [vmem:[#allocation5 + $0x74] ss:$8 sps:$4 sm:$0xff]  }
  0x30   :  { %541 = vmatmul.mubr.msk.bf16.vlgmr.msra.gmra.mrb[0].mxu0 %vm87_vm0, %v62_v8  ;;  %v676_v38 = vld [vmem:[#allocation5 + $0x60] ss:$8 sps:$4 sm:$0xff]   ;;  %v679_v40 = vld [vmem:[#allocation5 + $0x70] ss:$8 sps:$4 sm:$0xff]  }
  0x31   :  { %387 = vmatprep.mubr.bf16.mxu0 %v766_v0  ;;  %601 = vmatpush3.bf16.msra.mxu1 %v652_v9  ;;  %v682_v41 = vld [vmem:[%s946_s7] sm:$0xff]   ;;  %v683_v42 = vld [vmem:[%s946_s7 + $0x8] sm:$0xff]   ;;  %v684_v43 = vld [vmem:[%s946_s7 + $0x10] sm:$0xff]  }
  0x32   :  { %602 = vmatprep.subr.bf16.mxu1 %v767_v1  ;;  %356 = vmatpush1.bf16.msra.mxu0 %v658_v15  ;;  %v685_v44 = vld [vmem:[%s946_s7 + $0x18] sm:$0xff]   ;;  %v686_v45 = vld [vmem:[%s946_s7 + $0x20] sm:$0xff]   ;;  %v687_v56 = vld [vmem:[%s946_s7 + $0x28] sm:$0xff]  }
  0x33   :  { %357 = vmatprep.subr.bf16.mxu0 %v663_v17  ;;  %v543_v46 = vld [vmem:[%s943_s4] ss:$0 sm:$0xff]  ;;  %v688_v57 = vld [vmem:[%s946_s7 + $0x30] sm:$0xff]   ;;  %v689_v58 = vld [vmem:[%s946_s7 + $0x38] sm:$0xff]   ;;  %s769_s7 = smov [#allocation7]  }
  0x34   :  { %v568_v59 = vld [vmem:[%s945_s6] ss:$0 sm:$0xff]  ;;  %s527_s26 = sshll.u32 %s769_s7, 4  ;;  %s528_s26 = int_to_ptr.vmem [resolvable:$true] %s527_s26 }
  0x35   :  { %603 = vmatpush3.bf16.msra.mxu1 %v653_v10  ;;  %s734_s6 = scalar_lea.vmem %s528_s26, 128  ;;  %p739_p3 = scmp.lt.s32.totalorder %s528_s26, %s528_s26 }
  0x36   :  { %604 = vmatprep.subr.bf16.mxu1 %v767_v1  ;;  %358 = vmatpush1.bf16.msra.mxu0 %v661_v18  ;;  %p735_p2 = scmp.ne.s32.totalorder %s528_s26, %s734_s6  ;;  %p740_p4 = scmp.lt.s32.totalorder %s734_s6, %s734_s6 }
  0x37   :  { %359 = vmatprep.subr.bf16.mxu0 %v666_v19 }
  0x38   :  { %p741_p5 = por %p740_p4, %p739_p3 }
  0x39   :  { %605 = vmatpush3.bf16.msra.mxu1 %v654_v11 }
  0x3a   :  { %606 = vmatprep.subr.bf16.mxu1 %v767_v1  ;;  %360 = vmatpush1.bf16.msra.mxu0 %v664_v20  ;;  %p742_p6 = pnand %p741_p5, %p735_p2 }
  0x3b   :  { %361 = vmatprep.subr.bf16.mxu0 %v669_v21 }
  0x3d   :  { %607 = vmatpush3.bf16.msra.mxu1 %v655_v12 }
  0x3e   :  { %608 = vmatprep.subr.bf16.mxu1 %v767_v1  ;;  %362 = vmatpush1.bf16.msra.mxu0 %v667_v22 }
  0x3f   :  { %363 = vmatprep.subr.bf16.mxu0 %v672_v23 }
  0x41   :  { %609 = vmatpush3.bf16.msra.mxu1 %v656_v13 }
  0x42   :  { %610 = vmatprep.subr.bf16.mxu1 %v767_v1  ;;  %364 = vmatpush1.bf16.msra.mxu0 %v670_v24 }
  0x43   :  { %365 = vmatprep.subr.bf16.mxu0 %v675_v25 }
  0x45   :  { %611 = vmatpush3.bf16.msra.mxu1 %v657_v14 }
  0x46   :  { %616 = vmatprep.subr.bf16.mxu1 %v767_v1  ;;  %366 = vmatpush1.bf16.msra.mxu0 %v673_v26 }
  0x47   :  { %367 = vmatprep.subr.bf16.mxu0 %v678_v37 }
  0x4a   :  { %368 = vmatpush1.bf16.msra.mxu0 %v676_v38 }
  0x4b   :  { %369 = vmatprep.subr.bf16.mxu0 %v681_v39 }
  0x4e   :  { %370 = vmatpush1.bf16.msra.mxu0 %v679_v40 }
 0x103   :  { %v125_v28 = vpop.f32.mrb[0].mxu0 }
 0x104   :  { %v139_v29 = vadd.f32 %v542_v27, %v125_v28  ;;  %v127_v30 = vpop.f32.mrb[1].mxu0 }
 0x105   :  { %v129_v31 = vpop.f32.mrb[2].mxu0 }
 0x106   :  { %v140_v32 = vmul.f32 0.01, %v139_v29  ;;  %v130_v33 = vpop.f32.mrb[3].mxu0 }
 0x108   :  { %v141_v34 = vmax.f32 %v139_v29, %v140_v32 }
 0x10a   :  { %v142_v35 = vadd.f32 %v141_v34, %v127_v30 }
 0x10c   :  { %v143_v36 = vpack.c.bf16 %v142_v35, %v142_v35 }
 0x10e   :  { %613 = vmatmul.mubr.bf16.vlgmr.msra.gmra.mrb[0].mxu1 %v143_v36 }
 0x10f   :  { %632 = vmatprep.mubr.msk.bf16.mxu1 %vm768_vm1, %v767_v1  ;;  %617 = vmatpush3.bf16.msra.mxu1 %v682_v41 }
 0x110   :  { %618 = vmatprep.subr.bf16.mxu1 %v767_v1 }
 0x113   :  { %619 = vmatpush3.bf16.msra.mxu1 %v683_v42 }
 0x114   :  { %620 = vmatprep.subr.bf16.mxu1 %v767_v1 }
 0x117   :  { %621 = vmatpush3.bf16.msra.mxu1 %v684_v43 }
 0x118   :  { %622 = vmatprep.subr.bf16.mxu1 %v767_v1 }
 0x11b   :  { %623 = vmatpush3.bf16.msra.mxu1 %v685_v44 }
 0x11c   :  { %624 = vmatprep.subr.bf16.mxu1 %v767_v1 }
 0x11f   :  { %625 = vmatpush3.bf16.msra.mxu1 %v686_v45 }
 0x120   :  { %626 = vmatprep.subr.bf16.mxu1 %v767_v1 }
 0x123   :  { %627 = vmatpush3.bf16.msra.mxu1 %v687_v56 }
 0x124   :  { %628 = vmatprep.subr.bf16.mxu1 %v767_v1 }
 0x127   :  { %629 = vmatpush3.bf16.msra.mxu1 %v688_v57 }
 0x128   :  { %630 = vmatprep.subr.bf16.mxu1 %v767_v1  ;;  %v569_v1 = vld [vmem:[%s947_s8] ss:$0 sm:$0xff] }
 0x12b   :  { %631 = vmatpush3.bf16.msra.mxu1 %v689_v58 }
 0x1e1   :  { %v249_v47 = vpop.f32.mrb[0].mxu1 }
 0x1e2   :  { %v250_v48 = vadd.f32 %v543_v46, %v249_v47  ;;  %v614_v49 = vpop.f32.mrb[1].mxu1 }
 0x1e3   :  { %v252_v50 = vpop.f32.mrb[2].mxu1 }
 0x1e4   :  { %v255_v51 = vmul.f32 0.01, %v250_v48  ;;  %v615_v52 = vpop.f32.mrb[3].mxu1 }
 0x1e6   :  { %v256_v53 = vmax.f32 %v250_v48, %v255_v51 }
 0x1e8   :  { %v257_v54 = vadd.f32 %v256_v53, %v142_v35 }
 0x1ea   :  { %v258_v55 = vpack.c.bf16 %v257_v54, %v257_v54 }
 0x1ec   :  { %388 = vmatmul.mubr.bf16.vlgmr.msra.gmra.mrb[4].mxu0 %v258_v55 }
 0x2bf   :  { %v389_v60 = vpop.f32.mrb[4].mxu0 }
 0x2c0   :  { %v403_v61 = vadd.f32 %v568_v59, %v389_v60  ;;  %v391_v62 = vpop.f32.mrb[5].mxu0 }
 0x2c1   :  { %v393_v63 = vpop.f32.mrb[6].mxu0 }
 0x2c2   :  { %v404_v0 = vmul.f32 0.01, %v403_v61  ;;  %v394_v2 = vpop.f32.mrb[7].mxu0 }
 0x2c4   :  { %v405_v3 = vmax.f32 %v403_v61, %v404_v0 }
 0x2c6   :  { %v406_v4 = vadd.f32 %v405_v3, %v391_v62 }
 0x2c8   :  { %v407_v5 = vpack.c.bf16 %v406_v4, %v406_v4 }
 0x2ca   :  { %633 = vmatmul.mubr.bf16.vlgmr.msra.gmra.mrb[4].mxu1 %v407_v5 }
 0x39d   :  { %v513_v6 = vpop.f32.mrb[4].mxu1 }
 0x39e   :  { %v514_v7 = vadd.f32 %v569_v1, %v513_v6  ;;  %v634_v8 = vpop.f32.mrb[5].mxu1 }
 0x39f   :  { %v516_v9 = vpop.f32.mrb[6].mxu1 }
 0x3a0   :  { %v635_v10 = vpop.f32.mrb[7].mxu1  ;;  %520 = vst.msk [vmem:[#allocation7] sm:$0xff] %vm519_vm2, %v514_v7 }
 0x3a1   :  { %745 = shalt.err (!%p742_p6)
}
 0x3a2   :  { %s746_s8 = scalar_lea.hbm %s948_s9, 128 }
 0x3a3   :  { %p747_p7 = scmp.ne.s32.totalorder %s948_s9, %s746_s8  ;;  %p750_p8 = scmp.lt.u32.totalorder %s746_s8, %s948_s9 }
 0x3a5   :  { %p752_p9 = pnand %p750_p8, %p747_p7 }
 0x3a7   :  { %755 = shalt.err (!%p752_p9)
}
 0x3a8   :  { %530 = dma.vmem_to_hbm [thread:$0]  %s528_s26, 128, %s948_s9, [#allocation4]  }
 0x3a9   :  { %760 = dma.done.wait [#allocation4], 128  }
 0x3aa   :  { %761 = vsyncadd [#allocation4], 4294967168 }
 0x3ab   :  { %534 = vsyncpa [#allocation3], 1 }
 0x3ac   :  { %535 = vsyncpa [#allocation6], 1 }
 0x3ad   :  { %536 = vsyncpa [#allocation4], 1 }

// kernel: tpu_custom_call.1
= control target key start
LH: loop header
LB: loop body
LE: loop exit
PB: predicated region body
PF: predicated region fallthrough
CT: control target
= control target key end

     0   :  { %14 = vsyncpa [#allocation3], 0  ;;  %s939_s0 = inlined_call_operand.vmem [shape: bf16[8,32], index: 0, kind: input, shape index: {}]   ;;  %s940_s1 = inlined_call_operand.hbm [shape: bf16[32,256], index: 1, kind: input, shape index: {}]   ;;  %s941_s2 = inlined_call_operand.vmem [shape: f32[1,128], index: 2, kind: input, shape index: {}]   ;;  %s942_s3 = inlined_call_operand.vmem [shape: bf16[128,128], index: 3, kind: input, shape index: {}]   ;;  %s943_s4 = inlined_call_operand.vmem [shape: f32[1,128], index: 4, kind: input, shape index: {}]   ;;  %s944_s5 = inlined_call_operand.hbm [shape: bf16[128,256], index: 5, kind: input, shape index: {}]   ;;  %s945_s6 = inlined_call_operand.vmem [shape: f32[1,128], index: 6, kind: input, shape index: {}]   ;;  %s946_s7 = inlined_call_operand.vmem [shape: bf16[128,16], index: 7, kind: input, shape index: {}]   ;;  %s947_s8 = inlined_call_operand.vmem [shape: f32[1,16], index: 8, kind: input, shape index: {}]   ;;  %s948_s9 = inlined_call_operand.hbm [shape: f32[8,16], index: 9, kind: output, shape index: {}]  }
   0x1   :  { %15 = vsyncpa [#allocation6], 0 }
   0x2   :  { %16 = vsyncpa [#allocation4], 0  ;;  %s762_s30 = smov [#allocation2]   ;;  %s690_s13 = scalar_lea.hbm %s940_s1, 512 }
   0x3   :  { %s24_s10 = sshll.u32 %s762_s30, 4  ;;  %p691_p0 = scmp.ne.s32.totalorder %s940_s1, %s690_s13  ;;  %s25_s10 = int_to_ptr.vmem [resolvable:$true] %s24_s10 }
   0x4   :  { %p694_p1 = scmp.lt.u32.totalorder %s690_s13, %s940_s1 }
   0x6   :  { %p696_p2 = pnand %p694_p1, %p691_p0 }
   0x8   :  { %699 = shalt.err (!%p696_p2)
}
   0x9   :  { %s700_s18 = scalar_lea.vmem %s25_s10, 512  ;;  %p705_p4 = scmp.lt.s32.totalorder %s25_s10, %s25_s10 }
   0xa   :  { %p701_p3 = scmp.ne.s32.totalorder %s25_s10, %s700_s18  ;;  %p706_p5 = scmp.lt.s32.totalorder %s700_s18, %s700_s18 }
   0xc   :  { %p707_p6 = por %p706_p5, %p705_p4 }
   0xe   :  { %p708_p7 = pnand %p707_p6, %p701_p3 }
  0x10   :  { %711 = shalt.err (!%p708_p7)
}
  0x11   :  { %s763_s19 = smov 128   ;;  %s764_s20 = smov 8  }
  0x12   :  { %30 = dma.hbm_to_vmem [thread:$0]  %s940_s1, 512, %s25_s10, [#allocation3], %s763_s19, %s763_s19, %s764_s20  }
  0x13   :  { %s765_s23 = smov [#allocation5]   ;;  %s712_s27 = scalar_lea.hbm %s944_s5, 2048 }
  0x14   :  { %s42_s24 = sshll.u32 %s765_s23, 4  ;;  %p713_p8 = scmp.ne.s32.totalorder %s944_s5, %s712_s27  ;;  %s43_s24 = int_to_ptr.vmem [resolvable:$true] %s42_s24 }
  0x15   :  { %p716_p9 = scmp.lt.u32.totalorder %s712_s27, %s944_s5 }
  0x17   :  { %p718_p10 = pnand %p716_p9, %p713_p8 }
  0x19   :  { %721 = shalt.err (!%p718_p10)
}
  0x1a   :  { %s722_s12 = scalar_lea.vmem %s43_s24, 2048  ;;  %p727_p12 = scmp.lt.s32.totalorder %s43_s24, %s43_s24 }
  0x1b   :  { %p723_p11 = scmp.ne.s32.totalorder %s43_s24, %s722_s12  ;;  %p728_p13 = scmp.lt.s32.totalorder %s722_s12, %s722_s12 }
  0x1d   :  { %p729_p0 = por %p728_p13, %p727_p12 }
  0x1f   :  { %p730_p1 = pnand %p729_p0, %p723_p11 }
  0x21   :  { %733 = shalt.err (!%p730_p1)
}
  0x22   :  { %48 = dma.hbm_to_vmem [thread:$0]  %s944_s5, 2048, %s43_s24, [#allocation6], %s763_s19, %s763_s19, %s764_s20  }
  0x23   :  { %756 = dma.done.wait [#allocation3], 512  }
  0x24   :  { %757 = vsyncadd [#allocation3], 4294966784 }
  0x25   :  { %758 = dma.done.wait [#allocation6], 2048  }
  0x26   :  { %759 = vsyncadd [#allocation6], 4294965248  ;;  %v766_v0 = vmov 0   ;;  %v767_v1 = vmov 0.0   ;;  %v644_v2 = vld [vmem:[#allocation2 + $0x4] ss:$8 sps:$4 sm:$0xff]  }
  0x27   :  { %123 = vmatprep.mubr.bf16.mxu0 %v766_v0  ;;  %596 = vmatprep.subr.bf16.mxu1 %v767_v1  ;;  %v646_v3 = vld [vmem:[#allocation2] ss:$8 sps:$4 sm:$0xff]   ;;  %v647_v4 = vld [vmem:[#allocation2 + $0x14] ss:$8 sps:$4 sm:$0xff]   ;;  %v649_v5 = vld [vmem:[#allocation2 + $0x10] ss:$8 sps:$4 sm:$0xff]  }
  0x28   :  { %91 = vmatprep.subr.bf16.mxu0 %v644_v2  ;;  %v650_v6 = vld [vmem:[%s942_s3] sm:$0xff]   ;;  %v651_v7 = vld [vmem:[%s942_s3 + $0x8] sm:$0xff]   ;;  %vm87_vm0 = vcmask 261120   ;;  %v652_v9 = vld [vmem:[%s942_s3 + $0x10] sm:$0xff]   ;;  %vm768_vm1 = vmmov 0   ;;  %vm519_vm2 = vcmask 130048  }
  0x29   :  { %92 = vmatpush1.bf16.msra.mxu0 %v646_v3  ;;  %597 = vmatpush3.bf16.msra.mxu1 %v650_v6  ;;  %v62_v8 = vld [vmem:[%s939_s0] sm:$0xf]  ;;  %v653_v10 = vld [vmem:[%s942_s3 + $0x18] sm:$0xff]   ;;  %v655_v12 = vld [vmem:[%s942_s3 + $0x28] sm:$0xff]  }
  0x2a   :  { %93 = vmatprep.subr.bf16.mxu0 %v647_v4  ;;  %598 = vmatprep.subr.bf16.mxu1 %v767_v1  ;;  %v654_v11 = vld [vmem:[%s942_s3 + $0x20] sm:$0xff]   ;;  %v656_v13 = vld [vmem:[%s942_s3 + $0x30] sm:$0xff]   ;;  %v657_v14 = vld [vmem:[%s942_s3 + $0x38] sm:$0xff]  }
  0x2b   :  { %612 = vmatprep.mubr.msk.bf16.mxu1 %vm768_vm1, %v767_v1  ;;  %v658_v15 = vld [vmem:[#allocation5] ss:$8 sps:$4 sm:$0xff]   ;;  %v660_v16 = vld [vmem:[#allocation5 + $0x4] ss:$8 sps:$4 sm:$0xff]   ;;  %v663_v17 = vld [vmem:[#allocation5 + $0x14] ss:$8 sps:$4 sm:$0xff]  }
  0x2c   :  { %v661_v18 = vld [vmem:[#allocation5 + $0x10] ss:$8 sps:$4 sm:$0xff]   ;;  %v666_v19 = vld [vmem:[#allocation5 + $0x24] ss:$8 sps:$4 sm:$0xff]   ;;  %v664_v20 = vld [vmem:[#allocation5 + $0x20] ss:$8 sps:$4 sm:$0xff]  }
  0x2d   :  { %94 = vmatpush1.bf16.msra.mxu0 %v649_v5  ;;  %599 = vmatpush3.bf16.msra.mxu1 %v651_v7  ;;  %v669_v21 = vld [vmem:[#allocation5 + $0x34] ss:$8 sps:$4 sm:$0xff]   ;;  %v667_v22 = vld [vmem:[#allocation5 + $0x30] ss:$8 sps:$4 sm:$0xff]   ;;  %v672_v23 = vld [vmem:[#allocation5 + $0x44] ss:$8 sps:$4 sm:$0xff]  }
  0x2e   :  { %600 = vmatprep.subr.bf16.mxu1 %v767_v1  ;;  %355 = vmatprep.subr.bf16.mxu0 %v660_v16  ;;  %v670_v24 = vld [vmem:[#allocation5 + $0x40] ss:$8 sps:$4 sm:$0xff]   ;;  %v675_v25 = vld [vmem:[#allocation5 + $0x54] ss:$8 sps:$4 sm:$0xff]   ;;  %v673_v26 = vld [vmem:[#allocation5 + $0x50] ss:$8 sps:$4 sm:$0xff]  }
  0x2f   :  { %v542_v27 = vld [vmem:[%s941_s2] ss:$0 sm:$0xff]  ;;  %v678_v37 = vld [vmem:[#allocation5 + $0x64] ss:$8 sps:$4 sm:$0xff]   ;;  %v681_v39 = vld [vmem:[#allocation5 + $0x74] ss:$8 sps:$4 sm:$0xff]  }
  0x30   :  { %541 = vmatmul.mubr.msk.bf16.vlgmr.msra.gmra.mrb[0].mxu0 %vm87_vm0, %v62_v8  ;;  %v676_v38 = vld [vmem:[#allocation5 + $0x60] ss:$8 sps:$4 sm:$0xff]   ;;  %v679_v40 = vld [vmem:[#allocation5 + $0x70] ss:$8 sps:$4 sm:$0xff]  }
  0x31   :  { %387 = vmatprep.mubr.bf16.mxu0 %v766_v0  ;;  %601 = vmatpush3.bf16.msra.mxu1 %v652_v9  ;;  %v682_v41 = vld [vmem:[%s946_s7] sm:$0xff]   ;;  %v683_v42 = vld [vmem:[%s946_s7 + $0x8] sm:$0xff]   ;;  %v684_v43 = vld [vmem:[%s946_s7 + $0x10] sm:$0xff]  }
  0x32   :  { %602 = vmatprep.subr.bf16.mxu1 %v767_v1  ;;  %356 = vmatpush1.bf16.msra.mxu0 %v658_v15  ;;  %v685_v44 = vld [vmem:[%s946_s7 + $0x18] sm:$0xff]   ;;  %v686_v45 = vld [vmem:[%s946_s7 + $0x20] sm:$0xff]   ;;  %v687_v56 = vld [vmem:[%s946_s7 + $0x28] sm:$0xff]  }
  0x33   :  { %357 = vmatprep.subr.bf16.mxu0 %v663_v17  ;;  %v543_v46 = vld [vmem:[%s943_s4] ss:$0 sm:$0xff]  ;;  %v688_v57 = vld [vmem:[%s946_s7 + $0x30] sm:$0xff]   ;;  %v689_v58 = vld [vmem:[%s946_s7 + $0x38] sm:$0xff]   ;;  %s769_s7 = smov [#allocation7]  }
  0x34   :  { %v568_v59 = vld [vmem:[%s945_s6] ss:$0 sm:$0xff]  ;;  %s527_s26 = sshll.u32 %s769_s7, 4  ;;  %s528_s26 = int_to_ptr.vmem [resolvable:$true] %s527_s26 }
  0x35   :  { %603 = vmatpush3.bf16.msra.mxu1 %v653_v10  ;;  %s734_s6 = scalar_lea.vmem %s528_s26, 128  ;;  %p739_p3 = scmp.lt.s32.totalorder %s528_s26, %s528_s26 }
  0x36   :  { %604 = vmatprep.subr.bf16.mxu1 %v767_v1  ;;  %358 = vmatpush1.bf16.msra.mxu0 %v661_v18  ;;  %p735_p2 = scmp.ne.s32.totalorder %s528_s26, %s734_s6  ;;  %p740_p4 = scmp.lt.s32.totalorder %s734_s6, %s734_s6 }
  0x37   :  { %359 = vmatprep.subr.bf16.mxu0 %v666_v19 }
  0x38   :  { %p741_p5 = por %p740_p4, %p739_p3 }
  0x39   :  { %605 = vmatpush3.bf16.msra.mxu1 %v654_v11 }
  0x3a   :  { %606 = vmatprep.subr.bf16.mxu1 %v767_v1  ;;  %360 = vmatpush1.bf16.msra.mxu0 %v664_v20  ;;  %p742_p6 = pnand %p741_p5, %p735_p2 }
  0x3b   :  { %361 = vmatprep.subr.bf16.mxu0 %v669_v21 }
  0x3d   :  { %607 = vmatpush3.bf16.msra.mxu1 %v655_v12 }
  0x3e   :  { %608 = vmatprep.subr.bf16.mxu1 %v767_v1  ;;  %362 = vmatpush1.bf16.msra.mxu0 %v667_v22 }
  0x3f   :  { %363 = vmatprep.subr.bf16.mxu0 %v672_v23 }
  0x41   :  { %609 = vmatpush3.bf16.msra.mxu1 %v656_v13 }
  0x42   :  { %610 = vmatprep.subr.bf16.mxu1 %v767_v1  ;;  %364 = vmatpush1.bf16.msra.mxu0 %v670_v24 }
  0x43   :  { %365 = vmatprep.subr.bf16.mxu0 %v675_v25 }
  0x45   :  { %611 = vmatpush3.bf16.msra.mxu1 %v657_v14 }
  0x46   :  { %616 = vmatprep.subr.bf16.mxu1 %v767_v1  ;;  %366 = vmatpush1.bf16.msra.mxu0 %v673_v26 }
  0x47   :  { %367 = vmatprep.subr.bf16.mxu0 %v678_v37 }
  0x4a   :  { %368 = vmatpush1.bf16.msra.mxu0 %v676_v38 }
  0x4b   :  { %369 = vmatprep.subr.bf16.mxu0 %v681_v39 }
  0x4e   :  { %370 = vmatpush1.bf16.msra.mxu0 %v679_v40 }
 0x103   :  { %v125_v28 = vpop.f32.mrb[0].mxu0 }
 0x104   :  { %v139_v29 = vadd.f32 %v542_v27, %v125_v28  ;;  %v127_v30 = vpop.f32.mrb[1].mxu0 }
 0x105   :  { %v129_v31 = vpop.f32.mrb[2].mxu0 }
 0x106   :  { %v140_v32 = vmul.f32 0.01, %v139_v29  ;;  %v130_v33 = vpop.f32.mrb[3].mxu0 }
 0x108   :  { %v141_v34 = vmax.f32 %v139_v29, %v140_v32 }
 0x10a   :  { %v142_v35 = vadd.f32 %v141_v34, %v127_v30 }
 0x10c   :  { %v143_v36 = vpack.c.bf16 %v142_v35, %v142_v35 }
 0x10e   :  { %613 = vmatmul.mubr.bf16.vlgmr.msra.gmra.mrb[0].mxu1 %v143_v36 }
 0x10f   :  { %632 = vmatprep.mubr.msk.bf16.mxu1 %vm768_vm1, %v767_v1  ;;  %617 = vmatpush3.bf16.msra.mxu1 %v682_v41 }
 0x110   :  { %618 = vmatprep.subr.bf16.mxu1 %v767_v1 }
 0x113   :  { %619 = vmatpush3.bf16.msra.mxu1 %v683_v42 }
 0x114   :  { %620 = vmatprep.subr.bf16.mxu1 %v767_v1 }
 0x117   :  { %621 = vmatpush3.bf16.msra.mxu1 %v684_v43 }
 0x118   :  { %622 = vmatprep.subr.bf16.mxu1 %v767_v1 }
 0x11b   :  { %623 = vmatpush3.bf16.msra.mxu1 %v685_v44 }
 0x11c   :  { %624 = vmatprep.subr.bf16.mxu1 %v767_v1 }
 0x11f   :  { %625 = vmatpush3.bf16.msra.mxu1 %v686_v45 }
 0x120   :  { %626 = vmatprep.subr.bf16.mxu1 %v767_v1 }
 0x123   :  { %627 = vmatpush3.bf16.msra.mxu1 %v687_v56 }
 0x124   :  { %628 = vmatprep.subr.bf16.mxu1 %v767_v1 }
 0x127   :  { %629 = vmatpush3.bf16.msra.mxu1 %v688_v57 }
 0x128   :  { %630 = vmatprep.subr.bf16.mxu1 %v767_v1  ;;  %v569_v1 = vld [vmem:[%s947_s8] ss:$0 sm:$0xff] }
 0x12b   :  { %631 = vmatpush3.bf16.msra.mxu1 %v689_v58 }
 0x1e1   :  { %v249_v47 = vpop.f32.mrb[0].mxu1 }
 0x1e2   :  { %v250_v48 = vadd.f32 %v543_v46, %v249_v47  ;;  %v614_v49 = vpop.f32.mrb[1].mxu1 }
 0x1e3   :  { %v252_v50 = vpop.f32.mrb[2].mxu1 }
 0x1e4   :  { %v255_v51 = vmul.f32 0.01, %v250_v48  ;;  %v615_v52 = vpop.f32.mrb[3].mxu1 }
 0x1e6   :  { %v256_v53 = vmax.f32 %v250_v48, %v255_v51 }
 0x1e8   :  { %v257_v54 = vadd.f32 %v256_v53, %v142_v35 }
 0x1ea   :  { %v258_v55 = vpack.c.bf16 %v257_v54, %v257_v54 }
 0x1ec   :  { %388 = vmatmul.mubr.bf16.vlgmr.msra.gmra.mrb[4].mxu0 %v258_v55 }
 0x2bf   :  { %v389_v60 = vpop.f32.mrb[4].mxu0 }
 0x2c0   :  { %v403_v61 = vadd.f32 %v568_v59, %v389_v60  ;;  %v391_v62 = vpop.f32.mrb[5].mxu0 }
 0x2c1   :  { %v393_v63 = vpop.f32.mrb[6].mxu0 }
 0x2c2   :  { %v404_v0 = vmul.f32 0.01, %v403_v61  ;;  %v394_v2 = vpop.f32.mrb[7].mxu0 }
 0x2c4   :  { %v405_v3 = vmax.f32 %v403_v61, %v404_v0 }
 0x2c6   :  { %v406_v4 = vadd.f32 %v405_v3, %v391_v62 }
 0x2c8   :  { %v407_v5 = vpack.c.bf16 %v406_v4, %v406_v4 }
 0x2ca   :  { %633 = vmatmul.mubr.bf16.vlgmr.msra.gmra.mrb[4].mxu1 %v407_v5 }
 0x39d   :  { %v513_v6 = vpop.f32.mrb[4].mxu1 }
 0x39e   :  { %v514_v7 = vadd.f32 %v569_v1, %v513_v6  ;;  %v634_v8 = vpop.f32.mrb[5].mxu1 }
 0x39f   :  { %v516_v9 = vpop.f32.mrb[6].mxu1 }
 0x3a0   :  { %v635_v10 = vpop.f32.mrb[7].mxu1  ;;  %520 = vst.msk [vmem:[#allocation7] sm:$0xff] %vm519_vm2, %v514_v7 }
 0x3a1   :  { %745 = shalt.err (!%p742_p6)
}
 0x3a2   :  { %s746_s8 = scalar_lea.hbm %s948_s9, 128 }
 0x3a3   :  { %p747_p7 = scmp.ne.s32.totalorder %s948_s9, %s746_s8  ;;  %p750_p8 = scmp.lt.u32.totalorder %s746_s8, %s948_s9 }
 0x3a5   :  { %p752_p9 = pnand %p750_p8, %p747_p7 }
 0x3a7   :  { %755 = shalt.err (!%p752_p9)
}
 0x3a8   :  { %530 = dma.vmem_to_hbm [thread:$0]  %s528_s26, 128, %s948_s9, [#allocation4]  }
 0x3a9   :  { %760 = dma.done.wait [#allocation4], 128  }
 0x3aa   :  { %761 = vsyncadd [#allocation4], 4294967168 }
 0x3ab   :  { %534 = vsyncpa [#allocation3], 1 }
 0x3ac   :  { %535 = vsyncpa [#allocation6], 1 }
 0x3ad   :  { %536 = vsyncpa [#allocation4], 1 }

</bundles_post_ra>
